<compile_context>
chip_gen: v7x
topology: tpu7x:2x2x1
jax: 0.10.0
libtpu: 0.0.40
codegen_flags: <defaults>
</compile_context>

<pallas_src>
import jax
import jax.numpy as jnp
import numpy as np
from jax.experimental import pallas as pl
from jax.experimental.pallas import tpu as pltpu

IN_FEATURES = 5
HIDDEN_FEATURES = 25
OUT_FEATURES = 3

_DEFAULT_TILE_B = 8192                 # rows per grid step (batch-major layout)
_VMEM_LIMIT_BYTES = 32 * 1024 * 1024   # fits v5e scoped VMEM needs, << v7x 64 MiB physical


def _fused_affine_kernel(x_ref, w_ref, b_ref, o_ref):
    """o = x @ W + b for one batch tile.

    x_ref: (tile_b, IN)   batch-major input tile
    w_ref: (IN, OUT)      fused weight, VMEM-resident across the whole grid
    b_ref: (1, OUT)       fused bias (sublane-broadcast add)
    o_ref: (tile_b, OUT)  batch-major output tile
    """
    y = jnp.dot(x_ref[...], w_ref[...], preferred_element_type=jnp.float32)
    o_ref[...] = (y + b_ref[...]).astype(o_ref.dtype)


def fuse_params(w1_t, b1, w2_t, b2):
    """Collapse layer_2(layer_1(x)) into one affine map.  Call ONCE per model, not per step."""
    w = w1_t @ w2_t          # (5, 3)
    b = b1 @ w2_t + b2       # (1, 3)
    return w, b


def _round_up(n, m):
    return ((n + m - 1) // m) * m


def _pick_tile(batch, tile_b):
    """Choose a layout-legal, multi-core-friendly batch tile and grid size."""
    tile_b = max(128, _round_up(int(tile_b), 128))   # sublane/lane-legal tile
    b_pad = _round_up(batch, 128)
    if b_pad >= 256:
        # Keep >= 2 blocks so the "parallel" batch axis can split across v7x's 2 TCs.
        half = ((b_pad // 2) // 128) * 128
        tile_b = min(tile_b, half)
    if tile_b >= batch:
        return batch, 1                               # single full-extent block (always legal)
    return tile_b, pl.cdiv(batch, tile_b)


def fused_affine_pallas(x, w, b, *, tile_b=_DEFAULT_TILE_B):
    """x: (B, 5) f32, w: (5, 3), b: (1, 3) -> (B, 3) f32.  Batch-major, no wrapper copies."""
    batch = x.shape[0]
    tile, grid_b = _pick_tile(batch, tile_b)

    return pl.pallas_call(
        _fused_affine_kernel,
        out_shape=jax.ShapeDtypeStruct((batch, OUT_FEATURES), jnp.float32),
        grid=(grid_b,),
        in_specs=[
            # x tile: full feature extent, tile_b rows, marches with the batch grid.
            pl.BlockSpec((tile, IN_FEATURES), lambda i: (i, 0)),
            # Fused weight / bias: whole-array blocks, constant index maps -> stay resident.
            pl.BlockSpec((IN_FEATURES, OUT_FEATURES), lambda i: (0, 0)),
            pl.BlockSpec((1, OUT_FEATURES), lambda i: (0, 0)),
        ],
        out_specs=pl.BlockSpec((tile, OUT_FEATURES), lambda i: (i, 0)),
        compiler_params=pltpu.CompilerParams(
            dimension_semantics=("parallel",),        # shard the batch grid across TCs (v7x)
            vmem_limit_bytes=_VMEM_LIMIT_BYTES,
        ),
    )(x, w, b)


def make_cv_predictor(w1_t, b1, w2_t, b2, *, tile_b=_DEFAULT_TILE_B):
    """Fuse the two linears once and return a jitted forward that calls the Pallas kernel."""
    w, b = fuse_params(w1_t, b1, w2_t, b2)            # hoisted out of the per-call path

    @jax.jit
    def forward(x):
        return fused_affine_pallas(x, w, b, tile_b=tile_b)

    return forward


def cv_predictor_forward(x, w1_t, b1, w2_t, b2, *, tile_b=_DEFAULT_TILE_B):
    """Convenience wrapper matching layer_2(layer_1(x)).  Prefer make_cv_predictor (fuses once)."""
    w, b = fuse_params(w1_t, b1, w2_t, b2)
    return fused_affine_pallas(x, w, b, tile_b=tile_b)


def init_params(key):
    """Deterministic synthetic init matching PyTorch Linear shapes
    (layer_1.weight (25,5)/bias (25,); layer_2.weight (3,25)/bias (3,)),
    stored pre-transposed for the x @ W convention."""
    k1, k2, k3, k4 = jax.random.split(key, 4)
    bound1 = 1.0 / jnp.sqrt(5.0)
    bound2 = 1.0 / jnp.sqrt(25.0)
    w1_t = jax.random.uniform(k1, (IN_FEATURES, HIDDEN_FEATURES), jnp.float32, -bound1, bound1)
    b1 = jax.random.uniform(k2, (1, HIDDEN_FEATURES), jnp.float32, -bound1, bound1)
    w2_t = jax.random.uniform(k3, (HIDDEN_FEATURES, OUT_FEATURES), jnp.float32, -bound2, bound2)
    b2 = jax.random.uniform(k4, (1, OUT_FEATURES), jnp.float32, -bound2, bound2)
    return w1_t, b1, w2_t, b2


def _reference(x, w1_t, b1, w2_t, b2):
    """Unfused two-layer reference in float64 on the host (precision-independent)."""
    xn = np.asarray(x, np.float64)
    h = xn @ np.asarray(w1_t, np.float64) + np.asarray(b1, np.float64)
    return (h @ np.asarray(w2_t, np.float64) + np.asarray(b2, np.float64)).astype(np.float32)


if __name__ == "__main__":
    key = jax.random.PRNGKey(0)
    k_x, k_p = jax.random.split(key)

    w1_t, b1, w2_t, b2 = init_params(k_p)
    forward = make_cv_predictor(w1_t, b1, w2_t, b2)

    # Small demo batch; feature sizes are fixed by the module (5 -> 25 -> 3).
    batch = 8
    x = jax.random.normal(k_x, (batch, IN_FEATURES), dtype=jnp.float32)

    out = jax.block_until_ready(forward(x))
    ref = _reference(x, w1_t, b1, w2_t, b2)
    assert out.shape == (batch, OUT_FEATURES)
    assert jnp.allclose(out, ref, atol=1e-4, rtol=1e-4)

    # Multi-block path: batch not a tile multiple (grid of 3, ragged edge block).
    batch2 = 260
    x2 = jax.random.normal(jax.random.PRNGKey(1), (batch2, IN_FEATURES), dtype=jnp.float32)
    out2 = jax.block_until_ready(forward(x2))
    ref2 = _reference(x2, w1_t, b1, w2_t, b2)
    assert out2.shape == (batch2, OUT_FEATURES)
    assert jnp.allclose(out2, ref2, atol=1e-4, rtol=1e-4)

    print("KERNEL_OK")
</pallas_src>

<mosaic_0001>
module attributes {stable_mosaic.version = 11 : i64} {
  func.func @_fused_affine_kernel(%arg0: i32, %arg1: memref<8x5xf32, #tpu.memory_space<vmem>>, %arg2: memref<5x3xf32, #tpu.memory_space<vmem>>, %arg3: memref<1x3xf32, #tpu.memory_space<vmem>>, %arg4: memref<8x3xf32, #tpu.memory_space<vmem>>) attributes {dimension_semantics = [#tpu.dimension_semantics<parallel>], iteration_bounds = array<i64: 1>, scalar_prefetch = 0 : i64, scratch_operands = 0 : i64, tpu.core_type = #tpu.core_type<tc>, window_params = [{transform_indices = @transform_0, window_bounds = array<i64: 8, 5>}, {pipeline_mode = #tpu.pipeline_mode<synchronous>, transform_indices = @transform_1, window_bounds = array<i64: 5, 3>}, {pipeline_mode = #tpu.pipeline_mode<synchronous>, transform_indices = @transform_2, window_bounds = array<i64: 1, 3>}, {transform_indices = @transform_3, window_bounds = array<i64: 8, 3>}]} {
    %c0 = arith.constant 0 : index
    %c0_0 = arith.constant 0 : index
    %0 = vector.load %arg1[%c0, %c0_0] : memref<8x5xf32, #tpu.memory_space<vmem>>, vector<8x5xf32>
    %c0_1 = arith.constant 0 : index
    %c0_2 = arith.constant 0 : index
    %1 = vector.load %arg2[%c0_1, %c0_2] : memref<5x3xf32, #tpu.memory_space<vmem>>, vector<5x3xf32>
    %cst = arith.constant dense<0.000000e+00> : vector<8x3xf32>
    %2 = tpu.matmul %0, %1, %cst {dimension_numbers = #tpu.dot_dimension_numbers<[1], [0], [0], [1], [0, 0, 1, 1], [], []>} : vector<8x5xf32>, vector<5x3xf32>, vector<8x3xf32> -> vector<8x3xf32>
    %c0_3 = arith.constant 0 : index
    %c0_4 = arith.constant 0 : index
    %3 = vector.load %arg3[%c0_3, %c0_4] : memref<1x3xf32, #tpu.memory_space<vmem>>, vector<1x3xf32>
    %4 = vector.broadcast %3 : vector<1x3xf32> to vector<8x3xf32>
    %5 = arith.addf %2, %4 : vector<8x3xf32>
    %c0_5 = arith.constant 0 : index
    %c0_6 = arith.constant 0 : index
    %6 = vector.load %arg4[%c0_5, %c0_6] : memref<8x3xf32, #tpu.memory_space<vmem>>, vector<8x3xf32>
    tpu.vector_store %arg4[%c0_5, %c0_6], %5 {strides = array<i32>} : memref<8x3xf32, #tpu.memory_space<vmem>>, vector<8x3xf32>,
    return
  }
  func.func @transform_0(%arg0: i32) -> (i32, i32) {
    %c0_i32 = arith.constant 0 : i32
    %c0_i32_0 = arith.constant 0 : i32
    return %arg0, %c0_i32 : i32, i32
  }
  func.func @transform_1(%arg0: i32) -> (i32, i32) {
    %c0_i32 = arith.constant 0 : i32
    %c0_i32_0 = arith.constant 0 : i32
    %c0_i32_1 = arith.constant 0 : i32
    return %c0_i32, %c0_i32_0 : i32, i32
  }
  func.func @transform_2(%arg0: i32) -> (i32, i32) {
    %c0_i32 = arith.constant 0 : i32
    %c0_i32_0 = arith.constant 0 : i32
    %c0_i32_1 = arith.constant 0 : i32
    return %c0_i32, %c0_i32_0 : i32, i32
  }
  func.func @transform_3(%arg0: i32) -> (i32, i32) {
    %c0_i32 = arith.constant 0 : i32
    %c0_i32_0 = arith.constant 0 : i32
    return %arg0, %c0_i32 : i32, i32
  }
}

</mosaic_0001>

<bundles_post_ra>
// kernel: forward.1
= control target key start
LH: loop header
LB: loop body
LE: loop exit
PB: predicated region body
PF: predicated region fallthrough
CT: control target
= control target key end

     0   :  { %8 = vsyncpa [#allocation3], 0  ;;  %s249_s0 = inlined_call_operand.hbm [shape: f32[8,5], index: 0, kind: input, shape index: {}]   ;;  %s250_s1 = inlined_call_operand.hbm [shape: f32[5,3], index: 1, kind: input, shape index: {}]   ;;  %s251_s2 = inlined_call_operand.vmem [shape: f32[1,3], index: 2, kind: input, shape index: {}]   ;;  %s252_s3 = inlined_call_operand.vmem [shape: f32[8,3], index: 3, kind: output, shape index: {}]  }
   0x1   :  { %9 = vsyncpa [#allocation5], 0  ;;  %s195_s12 = smov [#allocation2]   ;;  %s196_s14 = smov [#allocation4]  }
   0x2   :  { %s16_s13 = sshll.u32 %s195_s12, 4  ;;  %s26_s15 = sshll.u32 %s196_s14, 4  ;;  %s17_s13 = int_to_ptr.vmem [resolvable:$true] %s16_s13  ;;  %s27_s15 = int_to_ptr.vmem [resolvable:$true] %s26_s15 }
   0x3   :  { %s147_s18 = scalar_lea.hbm %s249_s0, 128 }
   0x4   :  { %p148_p0 = scmp.ne.s32.totalorder %s249_s0, %s147_s18  ;;  %p151_p1 = scmp.lt.u32.totalorder %s147_s18, %s249_s0 }
   0x6   :  { %p153_p2 = pnand %p151_p1, %p148_p0 }
   0x8   :  { %156 = shalt.err (!%p153_p2)
}
   0x9   :  { %s157_s23 = scalar_lea.vmem %s17_s13, 128  ;;  %p162_p4 = scmp.lt.s32.totalorder %s17_s13, %s17_s13 }
   0xa   :  { %p158_p3 = scmp.ne.s32.totalorder %s17_s13, %s157_s23  ;;  %p163_p5 = scmp.lt.s32.totalorder %s157_s23, %s157_s23 }
   0xc   :  { %p164_p6 = por %p163_p5, %p162_p4 }
   0xe   :  { %p165_p7 = pnand %p164_p6, %p158_p3 }
  0x10   :  { %168 = shalt.err (!%p165_p7)
}
  0x11   :  { %19 = dma.hbm_to_vmem [thread:$0]  %s249_s0, 128, %s17_s13, [#allocation3]  }
  0x12   :  { %s169_s28 = scalar_lea.hbm %s250_s1, 128 }
  0x13   :  { %p170_p8 = scmp.ne.s32.totalorder %s250_s1, %s169_s28  ;;  %p173_p9 = scmp.lt.u32.totalorder %s169_s28, %s250_s1 }
  0x15   :  { %p175_p10 = pnand %p173_p9, %p170_p8 }
  0x17   :  { %178 = shalt.err (!%p175_p10)
}
  0x18   :  { %s179_s6 = scalar_lea.vmem %s27_s15, 128  ;;  %p184_p12 = scmp.lt.s32.totalorder %s27_s15, %s27_s15 }
  0x19   :  { %p180_p11 = scmp.ne.s32.totalorder %s27_s15, %s179_s6  ;;  %p185_p13 = scmp.lt.s32.totalorder %s179_s6, %s179_s6 }
  0x1b   :  { %p186_p0 = por %p185_p13, %p184_p12 }
  0x1d   :  { %p187_p1 = pnand %p186_p0, %p180_p11 }
  0x1f   :  { %190 = shalt.err (!%p187_p1)
}
  0x20   :  { %29 = dma.hbm_to_vmem [thread:$0]  %s250_s1, 128, %s27_s15, [#allocation5]  }
  0x21   :  { %191 = dma.done.wait [#allocation3], 128  }
  0x22   :  { %192 = vsyncadd [#allocation3], 4294967168 }
  0x23   :  { %193 = dma.done.wait [#allocation5], 128  }
  0x24   :  { %194 = vsyncadd [#allocation5], 4294967168  ;;  %v197_v0 = vmov 0.0   ;;  %vm198_vm0 = vmmov 0   ;;  %vm51_vm1 = vcmask 1044480   ;;  %vm47_vm2 = vcmask 39936  }
  0x25   :  { %138 = vmatprep.subr.mxu0 %v197_v0  ;;  %140 = vmatprep.mubr.msk.f32.mxu0 %vm198_vm0, %v197_v0  ;;  %v39_v1 = vld [vmem:[#allocation4] sm:$0x1f]  ;;  %v38_v2 = vld [vmem:[#allocation2] sm:$0xff]  ;;  %v133_v3 = vld [vmem:[%s251_s2] ss:$0 sm:$0xff]  ;;  %vm125_vm3 = vcmask 23552  }
  0x26   :  { %139 = vmatpush3.msk.msra.mxu0 %vm51_vm1, %v39_v1 }
  0x27   :  { %141 = vmatmul.mubr.msk.f32.vlgmr.msra.gmra.mrb[0].mxu0 %vm47_vm2, %v38_v2 }
  0xfa   :  { %v121_v4 = vpop.f32.mrb[0].mxu0 }
  0xfb   :  { %v122_v5 = vadd.f32 %v133_v3, %v121_v4  ;;  %v142_v6 = vpop.f32.mrb[1].mxu0 }
  0xfd   :  { %126 = vst.msk [vmem:[%s252_s3] sm:$0xff] %vm125_vm3, %v122_v5 }
  0xfe   :  { %131 = vsyncpa [#allocation3], 1 }
  0xff   :  { %132 = vsyncpa [#allocation5], 1 }

</bundles_post_ra>
